<compile_context>
chip_gen: v7x
topology: tpu7x:2x2x1
jax: 0.10.0
libtpu: 0.0.40
codegen_flags: <defaults>
</compile_context>

<pallas_src>
import jax
import jax.numpy as jnp
import numpy as np
from jax.experimental import pallas as pl
from jax.experimental.pallas import tpu as pltpu


def _make_act(activation, negative_slope=0.01):
    name = activation.lower()
    if name == "relu":
        return lambda x: jnp.maximum(x, 0.0)
    if name == "sine":
        return jnp.sin
    if name == "leakyrelu":
        return lambda x: jnp.where(x >= 0, x, negative_slope * x)
    if name == "sigmoid":
        return jax.nn.sigmoid
    if name == "tanh":
        return jnp.tanh
    raise NotImplementedError(activation)


def _round_up(x, m):
    return ((x + m - 1) // m) * m


def _make_mlp_kernel(n_layers, act, compute_dtype):
    def kernel(*refs):
        # refs = (x_ref, W0, b0, W1, b1, ..., Wf, bf, out_ref)
        x_ref = refs[0]
        out_ref = refs[-1]
        p = refs[1:-1]

        # h: [d_in, block_cols]  (batch on the lane axis -> fully packed vregs)
        h = x_ref[...].astype(compute_dtype)
        for layer in range(n_layers):
            w = p[2 * layer][...]                 # [d_out, d_in], compute_dtype
            b = p[2 * layer + 1][...]             # [d_out, 1], f32
            # bf16 (or f32) MXU inputs, f32 accumulate.
            y = jnp.dot(w, h, preferred_element_type=jnp.float32) + b
            if layer < n_layers - 1:
                # Activation in f32 (safe on v5e, negligible cost for ReLU);
                # cast back to compute_dtype so the next dot is MXU-native.
                # TODO(synk): on v6e/v7x a bf16 activation path could be used
                # if the EUP slot is the measured bottleneck for Sine/Tanh.
                h = act(y).astype(compute_dtype)
            else:
                h = y
        out_ref[...] = h.astype(out_ref.dtype)

    return kernel


def _mlp_pallas_impl(coords, params, *, n_hidden, activation="ReLU",
                     negative_slope=0.01, block_cols=8192,
                     io_dtype=None, mxu_dtype=jnp.bfloat16,
                     transposed_io=False):
    """MLP forward pass with a Pallas TPU kernel.

    coords: [N, in_features] array ([in_features, N] if transposed_io=True).
    params: flat list [W0, b0, ..., Wf, bf] in PyTorch layout
            (Wk: [d_out, d_in], bk: [d_out] or [d_out, 1]).
    block_cols: batch-tile width on the lane axis (rounded to multiple of 128).
    io_dtype: optional dtype (e.g. jnp.bfloat16) for HBM-side coords/out traffic.
    mxu_dtype: dtype fed to the MXU (bf16 default; f32 for exact math).
    """
    n_layers = n_hidden + 2
    assert len(params) == 2 * n_layers

    if transposed_io:
        in_features, N = coords.shape
        coords_t = coords
    else:
        N, in_features = coords.shape
        coords_t = coords.T                                 # fused inside jit
    out_features = params[-2].shape[0]

    io_dt = np.dtype(io_dtype) if io_dtype is not None else np.dtype(coords.dtype)
    mxu_dt = np.dtype(mxu_dtype)

    # ---- choose a lane-dense batch tile; pad N only to a multiple of 128 ----
    padded_n = _round_up(max(int(N), 1), 128)
    target = max(128, (int(block_cols) // 128) * 128)
    if padded_n <= target:
        bc = padded_n
    else:
        bc = target
        steps = pl.cdiv(padded_n, bc)
        if steps % 2 == 1:
            # v7x has 2 TensorCores: prefer an even step count when it does not
            # increase padding waste.
            bc2 = _round_up(pl.cdiv(padded_n, steps + 1), 128)
            if pl.cdiv(padded_n, bc2) % 2 == 0:
                bc = bc2
    grid_steps = pl.cdiv(padded_n, bc)

    if io_dt != coords_t.dtype:
        coords_t = coords_t.astype(io_dt)
    if padded_n != N:
        coords_t = jnp.pad(coords_t, ((0, 0), (0, padded_n - N)))

    # Weights pre-cast to the MXU dtype in the wrapper (they are VMEM-resident
    # across grid steps, so the cast happens once, not per step).  Biases are
    # added to the f32 accumulator, keep them f32 and shaped [d_out, 1].
    kernel_params = []
    for idx, p in enumerate(params):
        if idx % 2 == 0:
            kernel_params.append(p.astype(mxu_dt))
        else:
            kernel_params.append(p.reshape(p.shape[0], 1).astype(jnp.float32))

    # ---- cost estimate (advisory) -------------------------------------------
    dims = [(params[2 * l].shape[1], params[2 * l].shape[0]) for l in range(n_layers)]
    flops = 2 * padded_n * sum(di * do for di, do in dims)
    transcendentals = 0
    if activation.lower() in ("sine", "sigmoid", "tanh"):
        transcendentals = padded_n * sum(do for _, do in dims[:-1])
    weight_bytes = sum(int(np.prod(p.shape)) * p.dtype.itemsize for p in kernel_params)
    bytes_accessed = (padded_n * (in_features + out_features) * io_dt.itemsize
                      + weight_bytes)
    cost = pl.CostEstimate(flops=int(flops),
                           transcendentals=int(transcendentals),
                           bytes_accessed=int(bytes_accessed))

    # ---- honest VMEM budget: real per-step footprint + headroom --------------
    hidden_max = max(do for _, do in dims)
    footprint = (2 * in_features * bc * io_dt.itemsize        # in tile, dbl-buffered
                 + 2 * out_features * bc * io_dt.itemsize     # out tile, dbl-buffered
                 + 2 * weight_bytes                           # resident params
                 + 3 * hidden_max * bc * 4                    # live f32 intermediates
                 + 2 * hidden_max * bc * mxu_dt.itemsize)     # bf16 copies of h
    vmem_limit = int(min(64 * 1024 * 1024, max(2 * footprint, 8 * 1024 * 1024)))

    act = _make_act(activation, negative_slope)
    kernel = _make_mlp_kernel(n_layers, act, mxu_dt)

    # coords/out: tiled over the (lane) batch axis; weights/biases: whole array
    # with a constant index_map, so they stay VMEM-resident across grid steps.
    in_specs = [pl.BlockSpec((in_features, bc), lambda i: (0, i))]
    for p in kernel_params:
        in_specs.append(pl.BlockSpec(p.shape, lambda i: (0, 0)))
    out_spec = pl.BlockSpec((out_features, bc), lambda i: (0, i))

    out_t = pl.pallas_call(
        kernel,
        out_shape=jax.ShapeDtypeStruct((out_features, padded_n), io_dt),
        grid_spec=pltpu.PrefetchScalarGridSpec(
            num_scalar_prefetch=0,
            grid=(grid_steps,),
            in_specs=in_specs,
            out_specs=out_spec,
        ),
        compiler_params=pltpu.CompilerParams(
            dimension_semantics=("parallel",),
            vmem_limit_bytes=vmem_limit,
        ),
        cost_estimate=cost,
    )(coords_t, *kernel_params)

    # Slice off batch padding; restore layout & input dtype (fused inside jit).
    if transposed_io:
        return out_t[:, :N].astype(coords.dtype)
    return out_t[:, :N].T.astype(coords.dtype)


# Jitted entry point: the transpose/pad/cast plumbing fuses with the pallas_call.
mlp_pallas = jax.jit(
    _mlp_pallas_impl,
    static_argnames=("n_hidden", "activation", "negative_slope", "block_cols",
                     "io_dtype", "mxu_dtype", "transposed_io"),
)


def init_mlp_params(key, in_features, hidden_features, n_hidden, out_features,
                    bias=True, dtype=jnp.float32):
    """Synthetic init, PyTorch nn.Linear layout: W [d_out, d_in], b [d_out, 1]."""
    dims = [(in_features, hidden_features)]
    dims += [(hidden_features, hidden_features)] * n_hidden
    dims += [(hidden_features, out_features)]

    params = []
    for (d_in, d_out) in dims:
        key, kw, kb = jax.random.split(key, 3)
        bound = 1.0 / (d_in ** 0.5)
        w = jax.random.uniform(kw, (d_out, d_in), dtype, -bound, bound)
        if bias:
            b = jax.random.uniform(kb, (d_out, 1), dtype, -bound, bound)
        else:
            b = jnp.zeros((d_out, 1), dtype)
        params += [w, b]
    return params


def mlp_reference(coords, params, n_hidden, activation="ReLU", negative_slope=0.01):
    act = _make_act(activation, negative_slope)
    h = coords
    n_layers = n_hidden + 2
    for layer in range(n_layers):
        w = params[2 * layer]
        b = params[2 * layer + 1].reshape(-1)
        h = h @ w.T + b
        if layer < n_layers - 1:
            h = act(h)
    return h


if __name__ == "__main__":
    # Small shapes consistent with the module's forward: coords [N, in_features].
    in_features = 4
    hidden_features = 32
    n_hidden = 2
    out_features = 4
    N = 300  # not a multiple of 128 -> exercises padding + ragged tiles

    key = jax.random.PRNGKey(0)
    k_coords, k_params = jax.random.split(key)
    coords = jax.random.normal(k_coords, (N, in_features), jnp.float32)
    params = init_mlp_params(k_params, in_features, hidden_features,
                             n_hidden, out_features)

    # (a) Exact path: f32 MXU, small tile so the grid has multiple steps.
    out = mlp_pallas(coords, params, n_hidden=n_hidden, activation="ReLU",
                     block_cols=128, mxu_dtype=jnp.float32)
    out = jax.block_until_ready(out)
    ref = mlp_reference(coords, params, n_hidden, activation="ReLU")
    assert out.shape == (N, out_features)
    assert jnp.allclose(out, ref, atol=1e-4, rtol=1e-4), "ReLU f32 mismatch"

    # (b) Sine (SIREN-style) MLP, exact f32 path (EUP transcendentals).
    out_s = mlp_pallas(coords, params, n_hidden=n_hidden, activation="Sine",
                       block_cols=128, mxu_dtype=jnp.float32)
    out_s = jax.block_until_ready(out_s)
    ref_s = mlp_reference(coords, params, n_hidden, activation="Sine")
    assert jnp.allclose(out_s, ref_s, atol=1e-4, rtol=1e-4), "Sine f32 mismatch"

    # (c) Performance defaults: bf16 MXU inputs (f32 accumulate), big tile.
    out_fast = mlp_pallas(coords, params, n_hidden=n_hidden, activation="ReLU")
    out_fast = jax.block_until_ready(out_fast)
    assert out_fast.shape == (N, out_features)
    assert jnp.allclose(out_fast, ref, atol=1e-1, rtol=1e-1), "ReLU bf16 mismatch"

    print("KERNEL_OK")
</pallas_src>

<mosaic_0001>
module attributes {stable_mosaic.version = 11 : i64} {
  func.func @kernel(%arg0: i32, %arg1: memref<4x128xf32, #tpu.memory_space<vmem>>, %arg2: memref<32x4xf32, #tpu.memory_space<vmem>>, %arg3: memref<32x1xf32, #tpu.memory_space<vmem>>, %arg4: memref<32x32xf32, #tpu.memory_space<vmem>>, %arg5: memref<32x1xf32, #tpu.memory_space<vmem>>, %arg6: memref<32x32xf32, #tpu.memory_space<vmem>>, %arg7: memref<32x1xf32, #tpu.memory_space<vmem>>, %arg8: memref<4x32xf32, #tpu.memory_space<vmem>>, %arg9: memref<4x1xf32, #tpu.memory_space<vmem>>, %arg10: memref<4x128xf32, #tpu.memory_space<vmem>>) attributes {dimension_semantics = [#tpu.dimension_semantics<parallel>], iteration_bounds = array<i64: 3>, scalar_prefetch = 0 : i64, scratch_operands = 0 : i64, tpu.core_type = #tpu.core_type<tc>, window_params = [{transform_indices = @transform_0, window_bounds = array<i64: 4, 128>}, {pipeline_mode = #tpu.pipeline_mode<synchronous>, transform_indices = @transform_1, window_bounds = array<i64: 32, 4>}, {pipeline_mode = #tpu.pipeline_mode<synchronous>, transform_indices = @transform_2, window_bounds = array<i64: 32, 1>}, {pipeline_mode = #tpu.pipeline_mode<synchronous>, transform_indices = @transform_3, window_bounds = array<i64: 32, 32>}, {pipeline_mode = #tpu.pipeline_mode<synchronous>, transform_indices = @transform_4, window_bounds = array<i64: 32, 1>}, {pipeline_mode = #tpu.pipeline_mode<synchronous>, transform_indices = @transform_5, window_bounds = array<i64: 32, 32>}, {pipeline_mode = #tpu.pipeline_mode<synchronous>, transform_indices = @transform_6, window_bounds = array<i64: 32, 1>}, {pipeline_mode = #tpu.pipeline_mode<synchronous>, transform_indices = @transform_7, window_bounds = array<i64: 4, 32>}, {pipeline_mode = #tpu.pipeline_mode<synchronous>, transform_indices = @transform_8, window_bounds = array<i64: 4, 1>}, {transform_indices = @transform_9, window_bounds = array<i64: 4, 128>}]} {
    %c0 = arith.constant 0 : index
    %c0_0 = arith.constant 0 : index
    %0 = vector.load %arg1[%c0, %c0_0] : memref<4x128xf32, #tpu.memory_space<vmem>>, vector<4x128xf32>
    %c0_1 = arith.constant 0 : index
    %c0_2 = arith.constant 0 : index
    %1 = vector.load %arg2[%c0_1, %c0_2] : memref<32x4xf32, #tpu.memory_space<vmem>>, vector<32x4xf32>
    %c0_3 = arith.constant 0 : index
    %c0_4 = arith.constant 0 : index
    %2 = vector.load %arg3[%c0_3, %c0_4] : memref<32x1xf32, #tpu.memory_space<vmem>>, vector<32x1xf32>
    %cst = arith.constant dense<0.000000e+00> : vector<32x128xf32>
    %3 = tpu.matmul %1, %0, %cst {dimension_numbers = #tpu.dot_dimension_numbers<[1], [0], [0], [1], [0, 0, 1, 1], [], []>} : vector<32x4xf32>, vector<4x128xf32>, vector<32x128xf32> -> vector<32x128xf32>
    %4 = vector.broadcast %2 : vector<32x1xf32> to vector<32x128xf32>
    %5 = arith.addf %3, %4 : vector<32x128xf32>
    %cst_5 = arith.constant 0.000000e+00 : f32
    %6 = vector.broadcast %cst_5 : f32 to vector<32x128xf32>
    %7 = arith.maximumf %5, %6 : vector<32x128xf32>
    %c0_6 = arith.constant 0 : index
    %c0_7 = arith.constant 0 : index
    %8 = vector.load %arg4[%c0_6, %c0_7] : memref<32x32xf32, #tpu.memory_space<vmem>>, vector<32x32xf32>
    %c0_8 = arith.constant 0 : index
    %c0_9 = arith.constant 0 : index
    %9 = vector.load %arg5[%c0_8, %c0_9] : memref<32x1xf32, #tpu.memory_space<vmem>>, vector<32x1xf32>
    %cst_10 = arith.constant dense<0.000000e+00> : vector<32x128xf32>
    %10 = tpu.matmul %8, %7, %cst_10 {dimension_numbers = #tpu.dot_dimension_numbers<[1], [0], [0], [1], [0, 0, 1, 1], [], []>} : vector<32x32xf32>, vector<32x128xf32>, vector<32x128xf32> -> vector<32x128xf32>
    %11 = vector.broadcast %9 : vector<32x1xf32> to vector<32x128xf32>
    %12 = arith.addf %10, %11 : vector<32x128xf32>
    %cst_11 = arith.constant 0.000000e+00 : f32
    %13 = vector.broadcast %cst_11 : f32 to vector<32x128xf32>
    %14 = arith.maximumf %12, %13 : vector<32x128xf32>
    %c0_12 = arith.constant 0 : index
    %c0_13 = arith.constant 0 : index
    %15 = vector.load %arg6[%c0_12, %c0_13] : memref<32x32xf32, #tpu.memory_space<vmem>>, vector<32x32xf32>
    %c0_14 = arith.constant 0 : index
    %c0_15 = arith.constant 0 : index
    %16 = vector.load %arg7[%c0_14, %c0_15] : memref<32x1xf32, #tpu.memory_space<vmem>>, vector<32x1xf32>
    %cst_16 = arith.constant dense<0.000000e+00> : vector<32x128xf32>
    %17 = tpu.matmul %15, %14, %cst_16 {dimension_numbers = #tpu.dot_dimension_numbers<[1], [0], [0], [1], [0, 0, 1, 1], [], []>} : vector<32x32xf32>, vector<32x128xf32>, vector<32x128xf32> -> vector<32x128xf32>
    %18 = vector.broadcast %16 : vector<32x1xf32> to vector<32x128xf32>
    %19 = arith.addf %17, %18 : vector<32x128xf32>
    %cst_17 = arith.constant 0.000000e+00 : f32
    %20 = vector.broadcast %cst_17 : f32 to vector<32x128xf32>
    %21 = arith.maximumf %19, %20 : vector<32x128xf32>
    %c0_18 = arith.constant 0 : index
    %c0_19 = arith.constant 0 : index
    %22 = vector.load %arg8[%c0_18, %c0_19] : memref<4x32xf32, #tpu.memory_space<vmem>>, vector<4x32xf32>
    %c0_20 = arith.constant 0 : index
    %c0_21 = arith.constant 0 : index
    %23 = vector.load %arg9[%c0_20, %c0_21] : memref<4x1xf32, #tpu.memory_space<vmem>>, vector<4x1xf32>
    %cst_22 = arith.constant dense<0.000000e+00> : vector<4x128xf32>
    %24 = tpu.matmul %22, %21, %cst_22 {dimension_numbers = #tpu.dot_dimension_numbers<[1], [0], [0], [1], [0, 0, 1, 1], [], []>} : vector<4x32xf32>, vector<32x128xf32>, vector<4x128xf32> -> vector<4x128xf32>
    %25 = vector.broadcast %23 : vector<4x1xf32> to vector<4x128xf32>
    %26 = arith.addf %24, %25 : vector<4x128xf32>
    %c0_23 = arith.constant 0 : index
    %c0_24 = arith.constant 0 : index
    %27 = vector.load %arg10[%c0_23, %c0_24] : memref<4x128xf32, #tpu.memory_space<vmem>>, vector<4x128xf32>
    tpu.vector_store %arg10[%c0_23, %c0_24], %26 {strides = array<i32>} : memref<4x128xf32, #tpu.memory_space<vmem>>, vector<4x128xf32>,
    return
  }
  func.func @transform_0(%arg0: i32) -> (i32, i32) {
    %c0_i32 = arith.constant 0 : i32
    %c0_i32_0 = arith.constant 0 : i32
    return %c0_i32, %arg0 : i32, i32
  }
  func.func @transform_1(%arg0: i32) -> (i32, i32) {
    %c0_i32 = arith.constant 0 : i32
    %c0_i32_0 = arith.constant 0 : i32
    %c0_i32_1 = arith.constant 0 : i32
    return %c0_i32, %c0_i32_0 : i32, i32
  }
  func.func @transform_2(%arg0: i32) -> (i32, i32) {
    %c0_i32 = arith.constant 0 : i32
    %c0_i32_0 = arith.constant 0 : i32
    %c0_i32_1 = arith.constant 0 : i32
    return %c0_i32, %c0_i32_0 : i32, i32
  }
  func.func @transform_3(%arg0: i32) -> (i32, i32) {
    %c0_i32 = arith.constant 0 : i32
    %c0_i32_0 = arith.constant 0 : i32
    %c0_i32_1 = arith.constant 0 : i32
    return %c0_i32, %c0_i32_0 : i32, i32
  }
  func.func @transform_4(%arg0: i32) -> (i32, i32) {
    %c0_i32 = arith.constant 0 : i32
    %c0_i32_0 = arith.constant 0 : i32
    %c0_i32_1 = arith.constant 0 : i32
    return %c0_i32, %c0_i32_0 : i32, i32
  }
  func.func @transform_5(%arg0: i32) -> (i32, i32) {
    %c0_i32 = arith.constant 0 : i32
    %c0_i32_0 = arith.constant 0 : i32
    %c0_i32_1 = arith.constant 0 : i32
    return %c0_i32, %c0_i32_0 : i32, i32
  }
  func.func @transform_6(%arg0: i32) -> (i32, i32) {
    %c0_i32 = arith.constant 0 : i32
    %c0_i32_0 = arith.constant 0 : i32
    %c0_i32_1 = arith.constant 0 : i32
    return %c0_i32, %c0_i32_0 : i32, i32
  }
  func.func @transform_7(%arg0: i32) -> (i32, i32) {
    %c0_i32 = arith.constant 0 : i32
    %c0_i32_0 = arith.constant 0 : i32
    %c0_i32_1 = arith.constant 0 : i32
    return %c0_i32, %c0_i32_0 : i32, i32
  }
  func.func @transform_8(%arg0: i32) -> (i32, i32) {
    %c0_i32 = arith.constant 0 : i32
    %c0_i32_0 = arith.constant 0 : i32
    %c0_i32_1 = arith.constant 0 : i32
    return %c0_i32, %c0_i32_0 : i32, i32
  }
  func.func @transform_9(%arg0: i32) -> (i32, i32) {
    %c0_i32 = arith.constant 0 : i32
    %c0_i32_0 = arith.constant 0 : i32
    return %c0_i32, %arg0 : i32, i32
  }
}

</mosaic_0001>

<bundles_post_ra>
// kernel: _mlp_pallas_impl.1
= control target key start
LH: loop header
LB: loop body
LE: loop exit
PB: predicated region body
PF: predicated region fallthrough
CT: control target
= control target key end

     0   :  { %s1050_s30 = smov 0   ;;  %s1165_s0 = inlined_call_operand.vmem [shape: f32[4,384], index: 0, kind: input, shape index: {}]   ;;  %s1166_s1 = inlined_call_operand.vmem [shape: f32[32,4], index: 1, kind: input, shape index: {}]   ;;  %s1167_s2 = inlined_call_operand.vmem [shape: f32[32,1], index: 2, kind: input, shape index: {}]   ;;  %s1168_s3 = inlined_call_operand.vmem [shape: f32[32,32], index: 3, kind: input, shape index: {}]   ;;  %s1169_s4 = inlined_call_operand.vmem [shape: f32[32,1], index: 4, kind: input, shape index: {}]   ;;  %s1170_s5 = inlined_call_operand.vmem [shape: f32[32,32], index: 5, kind: input, shape index: {}]   ;;  %s1171_s6 = inlined_call_operand.vmem [shape: f32[32,1], index: 6, kind: input, shape index: {}]   ;;  %s1172_s7 = inlined_call_operand.vmem [shape: f32[4,32], index: 7, kind: input, shape index: {}]   ;;  %s1173_s8 = inlined_call_operand.vmem [shape: f32[4,1], index: 8, kind: input, shape index: {}]   ;;  %s1174_s9 = inlined_call_operand.vmem [shape: f32[4,384], index: 9, kind: output, shape index: {}]  }
   0x1 LB: > { %s856_s10 = sadd.s32 4294967295, %s994_s30   ;;  %p860_p0 = scmp.ge.s32.totalorder %s994_s30, 1  ;;  %s994_s30 = sphi %s1050_s30, %s19_s30  }
   0x2   : > { %p286_p1 = scmp.lt.s32.totalorder %s994_s30, 4 }
   0x4   : > { %p287_p2 = pnand %p860_p0, %p286_p1 }
   0x5   : > { %p320_p3 = scmp.lt.s32.totalorder (!%p287_p2), %s856_s10, 2  ;;  %v329_v0 = vld [vmem:[%s1166_s1] sm:$0xff] (!%p287_p2)  ;;  %vm357_vm0 = vcmask (!%p287_p2), 31744   ;;  %v996_v2 = vmov (!%p287_p2), 0   ;;  %v335_v3 = vld [vmem:[%s1167_s2 + $0x10] sm:$0xff] (!%p287_p2)  ;;  %vm370_vm1 = vcmask (!%p287_p2), 1043456  }
   0x6   : > { %290 = sbr.rel (%p287_p2) target bundleno = 914 (0x392), region = 56  ;;  %907 = vmatprep.mubr.msk.f32.mxu0 (!%p287_p2), %vm357_vm0, %v329_v0  ;;  %v333_v1 = vld [vmem:[%s1167_s2] sm:$0xff] (!%p287_p2)  ;;  %986 = vset.pattern.permute.xlu0 (!%p287_p2), %v996_v2  ;;  %v334_v4 = vld [vmem:[%s1167_s2 + $0x8] sm:$0xff] (!%p287_p2)  ;;  %v336_v5 = vld [vmem:[%s1167_s2 + $0x18] sm:$0xff] (!%p287_p2)  ;;  %vm491_vm2 = vcmask (!%p287_p2), 261120   ;;  %v997_v63 = vmov (!%p287_p2), 0.0|0.0  }
   0x7   : > { %987 = vset.pattern.permute.xlu1 (!%p287_p2), %v996_v2  ;;  %339 = vperm.xlu0 (!%p287_p2), %986, %v333_v1   ;;  %v330_v7 = vld [vmem:[%s1166_s1 + $0x8] sm:$0xff] (!%p287_p2)  ;;  %v331_v8 = vld [vmem:[%s1166_s1 + $0x10] sm:$0xff] (!%p287_p2)  ;;  %v467_v9 = vld [vmem:[%s1169_s4] sm:$0xff] (!%p287_p2)  ;;  %vm998_vm3 = vmmov (!%p287_p2), 0   ;;  %v999_v0 = vmov (!%p287_p2), 0.0  }
   0x8   : > { %349 = vperm.xlu1 (!%p287_p2), %987, %v335_v3   ;;  %v468_v10 = vld [vmem:[%s1169_s4 + $0x8] sm:$0xff] (!%p287_p2)  ;;  %v332_v11 = vld [vmem:[%s1166_s1 + $0x18] sm:$0xff] (!%p287_p2)  ;;  %v469_v12 = vld [vmem:[%s1169_s4 + $0x10] sm:$0xff] (!%p287_p2) }
   0x9   : > { %v470_v13 = vld [vmem:[%s1169_s4 + $0x18] sm:$0xff] (!%p287_p2)  ;;  %v597_v14 = vld [vmem:[%s1171_s6] sm:$0xff] (!%p287_p2)  ;;  %v598_v15 = vld [vmem:[%s1171_s6 + $0x8] sm:$0xff] (!%p287_p2) }
   0xa   : > { %v599_v16 = vld [vmem:[%s1171_s6 + $0x10] sm:$0xff] (!%p287_p2)  ;;  %v600_v17 = vld [vmem:[%s1171_s6 + $0x18] sm:$0xff] (!%p287_p2)  ;;  %v723_v18 = vld [vmem:[%s1173_s8] sm:$0xf] (!%p287_p2) }
   0xb   : > { %344 = vperm.xlu0 (!%p287_p2), %986, %v334_v4   ;;  %v463_v19 = vld [vmem:[%s1168_s3] sm:$0xff] (!%p287_p2)  ;;  %v464_v38 = vld [vmem:[%s1168_s3 + $0x8] sm:$0xff] (!%p287_p2)  ;;  %v465_v39 = vld [vmem:[%s1168_s3 + $0x10] sm:$0xff] (!%p287_p2) }
   0xc   : > { %354 = vperm.xlu1 (!%p287_p2), %987, %v336_v5   ;;  %921 = vmatprep.mubr.msk.f32.mxu1 (!%p287_p2), %vm491_vm2, %v463_v19  ;;  %v466_v40 = vld [vmem:[%s1168_s3 + $0x18] sm:$0xff] (!%p287_p2)  ;;  %v593_v41 = vld [vmem:[%s1170_s5] sm:$0xff] (!%p287_p2)  ;;  %v594_v60 = vld [vmem:[%s1170_s5 + $0x8] sm:$0xff] (!%p287_p2) }
   0xd   : > { %s1176_s10 = smov (!%p320_p3, %s856_s10), 2  ;;  %v595_v61 = vld [vmem:[%s1170_s5 + $0x10] sm:$0xff]  ;;  %v596_v62 = vld [vmem:[%s1170_s5 + $0x18] sm:$0xff]  ;;  %v722_v19 = vld [vmem:[%s1172_s7] sm:$0xf] }
   0xe   : > { %s861_s17 = sshll.u32 %s1176_s10, 2 }
   0xf   : > { %s323_s22 = scalar_lea.vmem %s1165_s0, %s861_s17  ;;  %473 = vperm.xlu0 %986, %v467_v9   ;;  %s327_s14 = scalar_lea.vmem %s1174_s9, %s861_s17 }
  0x10   : > { %v328_v6 = vld [vmem:[%s323_s22] sm:$0xf]  ;;  %478 = vperm.xlu1 %987, %v468_v10  }
  0x11   : > { %905 = vmatprep.subr.msk.mxu0 %vm370_vm1, %v328_v6 }
  0x12   : > { %906 = vmatpush3.msk.msra.mxu0 %vm370_vm1, %v328_v6 }
  0x13   : > { %908 = vmatmul.mubr.msk.f32.vlgmr.msra.gmra.mrb[0].mxu0 %vm357_vm0, %v330_v7  ;;  %483 = vperm.xlu0 %986, %v469_v12  }
  0x14   : > { %910 = vmatprep.mubr.msk.f32.mxu0 %vm357_vm0, %v331_v8  ;;  %488 = vperm.xlu1 %987, %v470_v13  }
  0x17   : > { %911 = vmatmul.mubr.msk.f32.gmra.mrb[2].mxu0 %vm357_vm0, %v332_v11  ;;  %603 = vperm.xlu0 %986, %v597_v14  }
  0x18   : > { %608 = vperm.xlu1 %987, %v598_v15   ;;  %935 = vmatprep.mubr.msk.f32.mxu0 %vm491_vm2, %v593_v41 }
  0x1b   : > { %613 = vperm.xlu0 %986, %v599_v16  }
  0x1c   : > { %618 = vperm.xlu1 %987, %v600_v17  }
  0x1f   : > { %726 = vperm.xlu0 %986, %v723_v18  }
  0x86   : > { %v340_v20 = vpop.permute.xlu0 %339 }
  0x87   : > { %v350_v21 = vpop.permute.xlu1 %349 }
  0x8a   : > { %v345_v22 = vpop.permute.xlu0 %344 }
  0x8b   : > { %v355_v28 = vpop.permute.xlu1 %354 }
  0x8e   : > { %v474_v43 = vpop.permute.xlu0 %473 }
  0x8f   : > { %v479_v42 = vpop.permute.xlu1 %478 }
  0x92   : > { %v484_v52 = vpop.permute.xlu0 %483 }
  0x93   : > { %v489_v49 = vpop.permute.xlu1 %488 }
  0x96   : > { %v604_v2 = vpop.permute.xlu0 %603 }
  0x97   : > { %v609_v1 = vpop.permute.xlu1 %608 }
  0x9a   : > { %v614_v11 = vpop.permute.xlu0 %613 }
  0x9b   : > { %v619_v8 = vpop.permute.xlu1 %618 }
  0xe6   : > { %v909_v23 = vpop.f32.mrb[0].mxu0 }
  0xe7   : > { %v446_v24 = vadd.f32 %v909_v23, %v345_v22  ;;  %v440_v25 = vpop.f32.mrb[1].mxu0 }
  0xe8   : > { %v441_v26 = vadd.f32 %v440_v25, %v340_v20  ;;  %v727_v20 = vpop.permute.xlu0 %726 }
  0xe9   : > { %v460_v27 = vmax.f32 %v446_v24, 0.0 }
  0xea   : > { %v459_v29 = vmax.f32 %v441_v26, 0.0  ;;  %v912_v30 = vpop.f32.mrb[2].mxu0 }
  0xeb   : > { %v456_v31 = vadd.f32 %v912_v30, %v355_v28  ;;  %v450_v32 = vpop.f32.mrb[3].mxu0 }
  0xec   : > { %v451_v33 = vadd.f32 %v450_v32, %v350_v21  ;;  %v952_v34 = vpack.c.bf16 %v460_v27, %v459_v29 }
  0xed   : > { %v462_v35 = vmax.f32 %v456_v31, 0.0 }
  0xee   : > { %v461_v36 = vmax.f32 %v451_v33, 0.0  ;;  %953 = vmatprep.subr.bf16.mxu1 %v952_v34 }
  0xef   : > { %955 = vmatpush3.bf16.msra.mxu1 %v952_v34 }
  0xf0   : > { %v956_v37 = vpack.c.bf16 %v462_v35, %v461_v36 }
  0xf2   : > { %957 = vmatprep.subr.bf16.mxu1 %v956_v37 }
  0xf3   : > { %959 = vmatpush3.bf16.msra.mxu1 %v956_v37 }
  0xf4   : > { %968 = vmatprep.subr.bf16.mxu1 %v997_v63 }
  0xf6   : > { %922 = vmatmul.mubr.msk.f32.vlgmr.msra.gmra.mrb[0].mxu1 %vm491_vm2, %v464_v38 }
  0xf7   : > { %924 = vmatprep.mubr.msk.f32.mxu1 %vm491_vm2, %v465_v39 }
  0xfa   : > { %925 = vmatmul.mubr.msk.f32.gmra.mrb[2].mxu1 %vm491_vm2, %v466_v40 }
  0xfb   : > { %949 = vmatprep.mubr.msk.f32.mxu1 %vm998_vm3, %v999_v0 }
 0x1c9   : > { %v923_v44 = vpop.f32.mrb[0].mxu1 }
 0x1ca   : > { %v576_v45 = vadd.f32 %v923_v44, %v479_v42  ;;  %v570_v46 = vpop.f32.mrb[1].mxu1 }
 0x1cb   : > { %v571_v47 = vadd.f32 %v570_v46, %v474_v43 }
 0x1cc   : > { %v590_v48 = vmax.f32 %v576_v45, 0.0 }
 0x1cd   : > { %v589_v50 = vmax.f32 %v571_v47, 0.0  ;;  %v926_v51 = vpop.f32.mrb[2].mxu1 }
 0x1ce   : > { %v586_v53 = vadd.f32 %v926_v51, %v489_v49  ;;  %v580_v54 = vpop.f32.mrb[3].mxu1 }
 0x1cf   : > { %v960_v55 = vpack.c.bf16 %v590_v48, %v589_v50  ;;  %v581_v56 = vadd.f32 %v580_v54, %v484_v52 }
 0x1d0   : > { %v592_v57 = vmax.f32 %v586_v53, 0.0 }
 0x1d1   : > { %v591_v58 = vmax.f32 %v581_v56, 0.0  ;;  %961 = vmatprep.subr.bf16.mxu0 %v960_v55 }
 0x1d2   : > { %963 = vmatpush3.bf16.msra.mxu0 %v960_v55 }
 0x1d3   : > { %v964_v59 = vpack.c.bf16 %v592_v57, %v591_v58 }
 0x1d5   : > { %965 = vmatprep.subr.bf16.mxu0 %v964_v59 }
 0x1d6   : > { %967 = vmatpush3.bf16.msra.mxu0 %v964_v59 }
 0x1d9   : > { %936 = vmatmul.mubr.msk.f32.vlgmr.msra.gmra.mrb[4].mxu0 %vm491_vm2, %v594_v60 }
 0x1da   : > { %938 = vmatprep.mubr.msk.f32.mxu0 %vm491_vm2, %v595_v61 }
 0x1dd   : > { %939 = vmatmul.mubr.msk.f32.gmra.mrb[6].mxu0 %vm491_vm2, %v596_v62 }
 0x2ac   : > { %v937_v3 = vpop.f32.mrb[4].mxu0 }
 0x2ad   : > { %v705_v4 = vadd.f32 %v937_v3, %v609_v1  ;;  %v699_v5 = vpop.f32.mrb[5].mxu0 }
 0x2ae   : > { %v700_v6 = vadd.f32 %v699_v5, %v604_v2 }
 0x2af   : > { %v719_v7 = vmax.f32 %v705_v4, 0.0 }
 0x2b0   : > { %v718_v9 = vmax.f32 %v700_v6, 0.0  ;;  %v940_v10 = vpop.f32.mrb[6].mxu0 }
 0x2b1   : > { %v715_v12 = vadd.f32 %v940_v10, %v619_v8  ;;  %v709_v13 = vpop.f32.mrb[7].mxu0 }
 0x2b2   : > { %v969_v14 = vpack.c.bf16 %v719_v7, %v718_v9  ;;  %v710_v15 = vadd.f32 %v709_v13, %v614_v11 }
 0x2b3   : > { %v721_v16 = vmax.f32 %v715_v12, 0.0 }
 0x2b4   : > { %v720_v17 = vmax.f32 %v710_v15, 0.0  ;;  %970 = vmatpush3.bf16.msra.mxu1 %v969_v14 }
 0x2b5   : > { %971 = vmatprep.subr.bf16.mxu1 %v997_v63 }
 0x2b6   : > { %v972_v18 = vpack.c.bf16 %v721_v16, %v720_v17 }
 0x2b8   : > { %973 = vmatpush3.bf16.msra.mxu1 %v972_v18 }
 0x2bb   : > { %950 = vmatmul.mubr.msk.f32.vlgmr.msra.gmra.mrb[4].mxu1 %vm491_vm2, %v722_v19 }
 0x38e   : > { %v798_v21 = vpop.f32.mrb[4].mxu1 }
 0x38f   : > { %v799_v22 = vadd.f32 %v798_v21, %v727_v20  ;;  %v951_v23 = vpop.f32.mrb[5].mxu1 }
 0x391   : > { %802 = vst [vmem:[%s327_s14] sm:$0xf] %v799_v22 }
 0x392 PF: > { %s19_s30 = sadd.s32 1, %s994_s30  }
 0x393   : > { %p16_p4 = scmp.ge.s32.totalorder %s19_s30, 5  }
 0x395   :  { %18 = sbr.rel (!%p16_p4) target bundleno = 1 (0x1), region = 86 }

</bundles_post_ra>
